<compile_context>
chip_gen: v7x
topology: tpu7x:2x2x1
jax: 0.10.0
libtpu: 0.0.40
codegen_flags: <defaults>
</compile_context>

<pallas_src>
import jax
import jax.numpy as jnp
from jax.experimental import pallas as pl
from jax.experimental.pallas import tpu as pltpu


def _interleave_matrix(n, s):
    """(s*n, s*n) 0/1 matrix M with M[k, j] = 1 iff k == (j % s) * n + j // s.

    For cat = [A_0 | A_1 | ... | A_{s-1}] (each (R, n)),  (cat @ M)[:, w*s + t] = A_t[:, w],
    i.e. M interleaves the s pieces column-wise.  Selection by a 0/1 matrix is exact.
    """
    k = jnp.arange(s * n)[:, None]
    j = jnp.arange(s * n)[None, :]
    return ((j % s) * n + j // s == k).astype(jnp.float32)


def _pick_tile_h(H, W, C, itemsize, budget_bytes=8 * 1024 * 1024):
    """H-tile: full-C row strips sized to a few MiB of VMEM (in+out, double-buffered)."""
    per_row = 4 * C * W * itemsize
    th_max = max(1, budget_bytes // per_row)
    if H <= th_max:
        return H
    th = (th_max // 8) * 8
    while th >= 8:
        if H % th == 0:
            return th
        th -= 8
    return H  # pathological H: fall back to a single full-H block


def _make_expand_kernel(s, c_out):
    def kernel(x_ref, p_ref, q_ref, o_ref):
        # x_ref: (1, C, TH, W)      input strip, all channels
        # p_ref: (s, W, s*W)        width-interleave selectors (p_ref[s2] puts cols at w*s+s2)
        # q_ref: (s, s*TH, TH)      height-interleave selectors (q_ref[s1] puts rows at h*s+s1)
        # o_ref: (1, C', s*TH, s*W) final-layout output strip
        for cp in range(c_out):
            acc = None
            for s1 in range(s):
                row = None  # (TH, s*W): width-interleaved strip for this s1
                for s2 in range(s):
                    a = x_ref[0, (s1 * s + s2) * c_out + cp].astype(jnp.float32)
                    t = jnp.dot(a, p_ref[s2], preferred_element_type=jnp.float32)
                    row = t if row is None else row + t
                t = jnp.dot(q_ref[s1], row, preferred_element_type=jnp.float32)
                acc = t if acc is None else acc + t
            o_ref[0, cp] = acc.astype(o_ref.dtype)

    return kernel


def expand_forward(x, gain=2):
    """Expand.forward: depth-to-space with gain s (out = (N, C//s^2, H*s, W*s))."""
    N, C, H, W = x.shape
    s = int(gain)
    assert C % (s * s) == 0, "C must be divisible by gain**2"
    c_out = C // (s * s)

    th = _pick_tile_h(H, W, C, x.dtype.itemsize)
    n_h = H // th
    assert n_h * th == H

    # Tiny constant selection matrices (built once, resident in VMEM during the grid).
    # TODO(synk): integer dtypes route through the f32 MXU selection path (exact only up to 2^24).
    p = _interleave_matrix(W, s).reshape(s, W, s * W)                 # (s, W, s*W)
    m_h = _interleave_matrix(th, s).T                                 # (s*th, s*th)
    q = jnp.stack([m_h[:, s1 * th:(s1 + 1) * th] for s1 in range(s)], axis=0)  # (s, s*th, th)

    kernel = _make_expand_kernel(s, c_out)

    return pl.pallas_call(
        kernel,
        out_shape=jax.ShapeDtypeStruct((N, c_out, s * H, s * W), x.dtype),
        grid_spec=pltpu.PrefetchScalarGridSpec(
            num_scalar_prefetch=0,
            grid=(N, n_h),
            in_specs=[
                pl.BlockSpec((1, C, th, W), lambda n, hb: (n, 0, hb, 0)),
                pl.BlockSpec((s, W, s * W), lambda n, hb: (0, 0, 0)),
                pl.BlockSpec((s, s * th, th), lambda n, hb: (0, 0, 0)),
            ],
            out_specs=pl.BlockSpec((1, c_out, s * th, s * W),
                                   lambda n, hb: (n, 0, hb, 0)),
        ),
        compiler_params=pltpu.CompilerParams(
            dimension_semantics=("parallel", "parallel")),
    )(x, p, q)


def _reference(x, gain=2):
    N, C, H, W = x.shape
    s = gain
    cp = C // (s * s)
    y = x.reshape(N, s, s, cp, H, W)
    y = jnp.transpose(y, (0, 3, 4, 1, 5, 2))
    return y.reshape(N, cp, H * s, W * s)


if __name__ == "__main__":
    key = jax.random.PRNGKey(0)
    k1, k2 = jax.random.split(key)

    # Primary test shape (matches the module's implied small config).
    x = jax.random.normal(k1, (2, 4, 16, 16), dtype=jnp.float32)
    out = jax.block_until_ready(expand_forward(x, gain=2))
    ref = _reference(x, gain=2)
    assert out.shape == (2, 1, 32, 32) and out.dtype == x.dtype, (out.shape, out.dtype)
    assert jnp.allclose(out, ref, atol=1e-5, rtol=1e-5), float(jnp.max(jnp.abs(out - ref)))

    # Second shape: multiple output channels, H not a multiple of 8 (full-dim blocks).
    x2 = jax.random.normal(k2, (2, 8, 12, 16), dtype=jnp.float32)
    out2 = jax.block_until_ready(expand_forward(x2, gain=2))
    ref2 = _reference(x2, gain=2)
    assert out2.shape == (2, 2, 24, 32), out2.shape
    assert jnp.allclose(out2, ref2, atol=1e-5, rtol=1e-5), float(jnp.max(jnp.abs(out2 - ref2)))

    print("KERNEL_OK")
</pallas_src>

<mosaic_0001>
module attributes {stable_mosaic.version = 11 : i64} {
  func.func @kernel(%arg0: i32, %arg1: i32, %arg2: memref<1x4x16x16xf32, #tpu.memory_space<vmem>>, %arg3: memref<2x16x32xf32, #tpu.memory_space<vmem>>, %arg4: memref<2x32x16xf32, #tpu.memory_space<vmem>>, %arg5: memref<1x1x32x32xf32, #tpu.memory_space<vmem>>) attributes {dimension_semantics = [#tpu.dimension_semantics<parallel>, #tpu.dimension_semantics<parallel>], iteration_bounds = array<i64: 2, 1>, scalar_prefetch = 0 : i64, scratch_operands = 0 : i64, tpu.core_type = #tpu.core_type<tc>, window_params = [{transform_indices = @transform_0, window_bounds = array<i64: 1, 4, 16, 16>}, {pipeline_mode = #tpu.pipeline_mode<synchronous>, transform_indices = @transform_1, window_bounds = array<i64: 2, 16, 32>}, {pipeline_mode = #tpu.pipeline_mode<synchronous>, transform_indices = @transform_2, window_bounds = array<i64: 2, 32, 16>}, {transform_indices = @transform_3, window_bounds = array<i64: 1, 1, 32, 32>}]} {
    %c0 = arith.constant 0 : index
    %c0_0 = arith.constant 0 : index
    %c0_1 = arith.constant 0 : index
    %c0_2 = arith.constant 0 : index
    %0 = vector.load %arg2[%c0, %c0_0, %c0_1, %c0_2] : memref<1x4x16x16xf32, #tpu.memory_space<vmem>>, vector<1x1x16x16xf32>
    %1 = vector.shape_cast %0 : vector<1x1x16x16xf32> to vector<16x16xf32>
    %c0_3 = arith.constant 0 : index
    %c0_4 = arith.constant 0 : index
    %c0_5 = arith.constant 0 : index
    %2 = vector.load %arg3[%c0_3, %c0_4, %c0_5] : memref<2x16x32xf32, #tpu.memory_space<vmem>>, vector<1x16x32xf32>
    %3 = vector.shape_cast %2 : vector<1x16x32xf32> to vector<16x32xf32>
    %cst = arith.constant dense<0.000000e+00> : vector<16x32xf32>
    %4 = tpu.matmul %1, %3, %cst {dimension_numbers = #tpu.dot_dimension_numbers<[1], [0], [0], [1], [0, 0, 1, 1], [], []>} : vector<16x16xf32>, vector<16x32xf32>, vector<16x32xf32> -> vector<16x32xf32>
    %c0_6 = arith.constant 0 : index
    %c1 = arith.constant 1 : index
    %c0_7 = arith.constant 0 : index
    %c0_8 = arith.constant 0 : index
    %5 = vector.load %arg2[%c0_6, %c1, %c0_7, %c0_8] : memref<1x4x16x16xf32, #tpu.memory_space<vmem>>, vector<1x1x16x16xf32>
    %6 = vector.shape_cast %5 : vector<1x1x16x16xf32> to vector<16x16xf32>
    %c1_9 = arith.constant 1 : index
    %c0_10 = arith.constant 0 : index
    %c0_11 = arith.constant 0 : index
    %7 = vector.load %arg3[%c1_9, %c0_10, %c0_11] : memref<2x16x32xf32, #tpu.memory_space<vmem>>, vector<1x16x32xf32>
    %8 = vector.shape_cast %7 : vector<1x16x32xf32> to vector<16x32xf32>
    %cst_12 = arith.constant dense<0.000000e+00> : vector<16x32xf32>
    %9 = tpu.matmul %6, %8, %cst_12 {dimension_numbers = #tpu.dot_dimension_numbers<[1], [0], [0], [1], [0, 0, 1, 1], [], []>} : vector<16x16xf32>, vector<16x32xf32>, vector<16x32xf32> -> vector<16x32xf32>
    %10 = arith.addf %4, %9 : vector<16x32xf32>
    %c0_13 = arith.constant 0 : index
    %c0_14 = arith.constant 0 : index
    %c0_15 = arith.constant 0 : index
    %11 = vector.load %arg4[%c0_13, %c0_14, %c0_15] : memref<2x32x16xf32, #tpu.memory_space<vmem>>, vector<1x32x16xf32>
    %12 = vector.shape_cast %11 : vector<1x32x16xf32> to vector<32x16xf32>
    %cst_16 = arith.constant dense<0.000000e+00> : vector<32x32xf32>
    %13 = tpu.matmul %12, %10, %cst_16 {dimension_numbers = #tpu.dot_dimension_numbers<[1], [0], [0], [1], [0, 0, 1, 1], [], []>} : vector<32x16xf32>, vector<16x32xf32>, vector<32x32xf32> -> vector<32x32xf32>
    %c0_17 = arith.constant 0 : index
    %c2 = arith.constant 2 : index
    %c0_18 = arith.constant 0 : index
    %c0_19 = arith.constant 0 : index
    %14 = vector.load %arg2[%c0_17, %c2, %c0_18, %c0_19] : memref<1x4x16x16xf32, #tpu.memory_space<vmem>>, vector<1x1x16x16xf32>
    %15 = vector.shape_cast %14 : vector<1x1x16x16xf32> to vector<16x16xf32>
    %c0_20 = arith.constant 0 : index
    %c0_21 = arith.constant 0 : index
    %c0_22 = arith.constant 0 : index
    %16 = vector.load %arg3[%c0_20, %c0_21, %c0_22] : memref<2x16x32xf32, #tpu.memory_space<vmem>>, vector<1x16x32xf32>
    %17 = vector.shape_cast %16 : vector<1x16x32xf32> to vector<16x32xf32>
    %cst_23 = arith.constant dense<0.000000e+00> : vector<16x32xf32>
    %18 = tpu.matmul %15, %17, %cst_23 {dimension_numbers = #tpu.dot_dimension_numbers<[1], [0], [0], [1], [0, 0, 1, 1], [], []>} : vector<16x16xf32>, vector<16x32xf32>, vector<16x32xf32> -> vector<16x32xf32>
    %c0_24 = arith.constant 0 : index
    %c3 = arith.constant 3 : index
    %c0_25 = arith.constant 0 : index
    %c0_26 = arith.constant 0 : index
    %19 = vector.load %arg2[%c0_24, %c3, %c0_25, %c0_26] : memref<1x4x16x16xf32, #tpu.memory_space<vmem>>, vector<1x1x16x16xf32>
    %20 = vector.shape_cast %19 : vector<1x1x16x16xf32> to vector<16x16xf32>
    %c1_27 = arith.constant 1 : index
    %c0_28 = arith.constant 0 : index
    %c0_29 = arith.constant 0 : index
    %21 = vector.load %arg3[%c1_27, %c0_28, %c0_29] : memref<2x16x32xf32, #tpu.memory_space<vmem>>, vector<1x16x32xf32>
    %22 = vector.shape_cast %21 : vector<1x16x32xf32> to vector<16x32xf32>
    %cst_30 = arith.constant dense<0.000000e+00> : vector<16x32xf32>
    %23 = tpu.matmul %20, %22, %cst_30 {dimension_numbers = #tpu.dot_dimension_numbers<[1], [0], [0], [1], [0, 0, 1, 1], [], []>} : vector<16x16xf32>, vector<16x32xf32>, vector<16x32xf32> -> vector<16x32xf32>
    %24 = arith.addf %18, %23 : vector<16x32xf32>
    %c1_31 = arith.constant 1 : index
    %c0_32 = arith.constant 0 : index
    %c0_33 = arith.constant 0 : index
    %25 = vector.load %arg4[%c1_31, %c0_32, %c0_33] : memref<2x32x16xf32, #tpu.memory_space<vmem>>, vector<1x32x16xf32>
    %26 = vector.shape_cast %25 : vector<1x32x16xf32> to vector<32x16xf32>
    %cst_34 = arith.constant dense<0.000000e+00> : vector<32x32xf32>
    %27 = tpu.matmul %26, %24, %cst_34 {dimension_numbers = #tpu.dot_dimension_numbers<[1], [0], [0], [1], [0, 0, 1, 1], [], []>} : vector<32x16xf32>, vector<16x32xf32>, vector<32x32xf32> -> vector<32x32xf32>
    %28 = arith.addf %13, %27 : vector<32x32xf32>
    %c0_35 = arith.constant 0 : index
    %c0_36 = arith.constant 0 : index
    %c0_37 = arith.constant 0 : index
    %c0_38 = arith.constant 0 : index
    %29 = vector.load %arg5[%c0_35, %c0_36, %c0_37, %c0_38] : memref<1x1x32x32xf32, #tpu.memory_space<vmem>>, vector<1x1x32x32xf32>
    %30 = vector.shape_cast %29 : vector<1x1x32x32xf32> to vector<32x32xf32>
    %31 = vector.shape_cast %28 : vector<32x32xf32> to vector<1x1x32x32xf32>
    tpu.vector_store %arg5[%c0_35, %c0_36, %c0_37, %c0_38], %31 {strides = array<i32>} : memref<1x1x32x32xf32, #tpu.memory_space<vmem>>, vector<1x1x32x32xf32>,
    return
  }
  func.func @transform_0(%arg0: i32, %arg1: i32) -> (i32, i32, i32, i32) {
    %c0_i32 = arith.constant 0 : i32
    %c0_i32_0 = arith.constant 0 : i32
    %c0_i32_1 = arith.constant 0 : i32
    return %arg0, %c0_i32, %arg1, %c0_i32_0 : i32, i32, i32, i32
  }
  func.func @transform_1(%arg0: i32, %arg1: i32) -> (i32, i32, i32) {
    %c0_i32 = arith.constant 0 : i32
    %c0_i32_0 = arith.constant 0 : i32
    %c0_i32_1 = arith.constant 0 : i32
    %c0_i32_2 = arith.constant 0 : i32
    return %c0_i32, %c0_i32_0, %c0_i32_1 : i32, i32, i32
  }
  func.func @transform_2(%arg0: i32, %arg1: i32) -> (i32, i32, i32) {
    %c0_i32 = arith.constant 0 : i32
    %c0_i32_0 = arith.constant 0 : i32
    %c0_i32_1 = arith.constant 0 : i32
    %c0_i32_2 = arith.constant 0 : i32
    return %c0_i32, %c0_i32_0, %c0_i32_1 : i32, i32, i32
  }
  func.func @transform_3(%arg0: i32, %arg1: i32) -> (i32, i32, i32, i32) {
    %c0_i32 = arith.constant 0 : i32
    %c0_i32_0 = arith.constant 0 : i32
    %c0_i32_1 = arith.constant 0 : i32
    return %arg0, %c0_i32, %arg1, %c0_i32_0 : i32, i32, i32, i32
  }
}

</mosaic_0001>

<bundles_post_ra>
// kernel: tpu_custom_call.1
= control target key start
LH: loop header
LB: loop body
LE: loop exit
PB: predicated region body
PF: predicated region fallthrough
CT: control target
= control target key end

     0   :  { %8 = vsyncpa [#allocation3], 0  ;;  %s1462_s0 = inlined_call_operand.hbm [shape: f32[2,4,16,16], index: 0, kind: input, shape index: {}]   ;;  %s1463_s1 = inlined_call_operand.vmem [shape: f32[2,16,32], index: 1, kind: input, shape index: {}]   ;;  %s1464_s2 = inlined_call_operand.vmem [shape: f32[2,32,16], index: 2, kind: input, shape index: {}]   ;;  %s1465_s3 = inlined_call_operand.hbm [shape: f32[2,1,32,32], index: 3, kind: output, shape index: {}]  }
   0x1   :  { %10 = vsyncpa [#allocation3 + $0x1], 0 }
   0x2   :  { %11 = vsyncpa [#allocation4], 0 }
   0x3   :  { %13 = vsyncpa [#allocation4 + $0x1], 0  ;;  %s1220_s12 = smov 0   ;;  %s1222_s13 = smov 0  }
   0x4   :  { %s1224_s14 = smov 0   ;;  %s1226_s15 = smov 0  }
   0x5   :  { %s1228_s16 = smov 0   ;;  %s1230_s17 = smov 0  }
   0x6 LB: > { %s861_s18 = sadd.s32 4294967295, %s1192_s17   ;;  %s862_s19 = sadd.s32 4294967294, %s1192_s17   ;;  %s1192_s17 = sphi %s1230_s17, %s19_s17   ;;  %s1188_s16 = sphi %s1228_s16, %s1480_s16   ;;  %s1184_s15 = sphi %s1226_s15, %s1479_s15   ;;  %s1180_s14 = sphi %s1224_s14, %s1478_s14   ;;  %s1176_s13 = sphi %s1222_s13, %s1477_s13   ;;  %s1172_s12 = sphi %s1220_s12, %s1476_s12  }
   0x7   : > { %s31_s20 = sadd.s32 1, %s1188_s16  ;;  %s40_s21 = sadd.s32 1, %s1180_s14 }
   0x8   : > { %p33_p0 = scmp.ge.s32.totalorder %s31_s20, 2  ;;  %p47_p1 = scmp.ne.s32.totalorder %s1180_s14, %s1176_s13 }
   0x9   : > { %p48_p2 = scmp.eq.s32.totalorder %s1192_s17, 0  ;;  %p53_p3 = scmp.ne.s32.totalorder %s1176_s13, %s1172_s12 }
   0xa   : > { %s1482_s20 = smov (%p33_p0, %s31_s20), 0  ;;  %p54_p5 = scmp.eq.s32.totalorder %s861_s18, 0 }
   0xb   : > { %p1261_p4 = por %p48_p2, %p47_p1  ;;  %s35_s23 = ssub.s32 %s1188_s16, %s1482_s20 }
   0xc   : > { %p121_p6 = scmp.eq.s32.totalorder %s861_s18, 1  ;;  %p38_p7 = scmp.eq.s32.totalorder %s35_s23, 0 }
   0xd   : > { %p1267_p8 = por %p54_p5, %p53_p3  ;;  %p127_p10 = scmp.eq.s32.totalorder %s862_s19, 1 }
   0xe   : > { %p1271_p9 = por %p121_p6, %p47_p1  ;;  %p1026_p13 = scmp.lt.s32.totalorder %s1192_s17, 2 }
   0xf   : > { %s1276_s26 = scalar_select %p38_p7, %s1180_s14, %s40_s21  }
  0x10   : > { %s1469_s25 = scalar_select %p1271_p9, 1, 0 }
  0x11   : > { %p1278_p11 = por %p127_p10, %p53_p3  ;;  %s153_s28 = sand.u32 1, %s1180_s14  }
  0x12   : > { %s865_s29 = sshll.u32 %s153_s28, 6  ;;  %s904_s30 = sshll.u32 %s1188_s16, 10 }
  0x13   : > { %s1470_s27 = scalar_select %p1278_p11, 1, 0 }
  0x14   : > { %s1289_s6 = scalar_lea.hbm %s1462_s0, %s904_s30  ;;  %s157_s7 = scalar_lea.vmem [#allocation2], %s865_s29 }
  0x15   : > { %s166_s8 = sshll.u32 %s157_s7, 4  ;;  %p1295_p0 = pnand %p1026_p13, %p1261_p4  ;;  %s1291_s8 = int_to_ptr.vmem [resolvable:$true] %s166_s8 }
  0x16   : > { %s1300_s10 = scalar_lea.sflag [#allocation3], %s153_s28  ;;  %s1080_s11 = scalar_lea.hbm %s1289_s6, 1024 }
  0x17   : > { %p1081_p2 = scmp.ne.s32.totalorder %s1289_s6, %s1080_s11  ;;  %p1082_p3 = pneg %p1295_p0 }
  0x18   : > { %s1085_s21 = scalar_lea.hbm %s1462_s0, 2048  ;;  %p1086_p4 = scmp.lt.u32.totalorder %s1289_s6, %s1462_s0 }
  0x19   : > { %p1083_p5 = pnand %p1082_p3, %p1081_p2  ;;  %p1087_p7 = scmp.lt.u32.totalorder %s1085_s21, %s1080_s11 }
  0x1a   : > { %p1089_p13 = scmp.lt.u32.totalorder %s1080_s11, %s1289_s6 }
  0x1b   : > { %p1084_p6 = pneg %p1083_p5  ;;  %p1088_p10 = por %p1087_p7, %p1086_p4 }
  0x1d   : > { %p1090_p12 = por %p1089_p13, %p1088_p10 }
  0x1f   : > { %p1091_p1 = pnand %p1090_p12, %p1084_p6 }
  0x21   : > { %1094 = shalt.err (!%p1091_p1)
}
  0x22   : > { %s1095_s28 = scalar_lea.vmem %s1291_s8, 1024  ;;  %s1194_s29 = smov [#allocation2]  }
  0x23   : > { %p1096_p2 = scmp.ne.s32.totalorder %s1291_s8, %s1095_s28  ;;  %s1100_s30 = sshll.u32 %s1194_s29, 4  ;;  %s1101_s30 = int_to_ptr.vmem [resolvable:$false] %s1100_s30 }
  0x24   : > { %s1102_s4 = scalar_lea.vmem %s1101_s30, 2048  ;;  %p1103_p9 = scmp.lt.s32.totalorder %s1291_s8, %s1101_s30 }
  0x25   : > { %p1098_p5 = pnand %p1096_p2, %p1082_p3  ;;  %p1104_p4 = scmp.lt.s32.totalorder %s1102_s4, %s1095_s28 }
  0x27   : > { %p1099_p11 = pneg %p1098_p5  ;;  %p1105_p7 = por %p1104_p4, %p1103_p9 }
  0x29   : > { %p1106_p10 = pnand %p1105_p7, %p1099_p11 }
  0x2b   : > { %1109 = shalt.err (!%p1106_p10)
}
  0x2c   : > { %s1195_s5 = smov 128   ;;  %s1196_s7 = smov 8  }
  0x2d   : > { %1021 = dma.hbm_to_vmem [thread:$0]  (!%p1295_p0), %s1289_s6, 1024, %s1291_s8, %s1300_s10, %s1195_s5, %s1195_s5, %s1196_s7  }
  0x2e   : > { %p174_p12 = scmp.lt.s32.totalorder %s1192_s17, 3  ;;  %p1472_p1 = scmp.ge.s32.totalorder %s1192_s17, 1 }
  0x30   : > { %p175_p3 = pnand %p1472_p1, %p174_p12 }
  0x31   : > { %s1332_s11 = sand.u32 (!%p175_p3), 1, %s1176_s13  }
  0x32   : > { %178 = sbr.rel (%p175_p3) target bundleno = 527 (0x20f), region = 32  ;;  %s869_s18 = sshll.u32 (!%p175_p3), %s1332_s11, 6 }
  0x33   : > { %s181_s19 = scalar_lea.sflag (!%p175_p3), [#allocation3], %s1332_s11  ;;  %s1336_s21 = scalar_lea.vmem (!%p175_p3), [#allocation2], %s869_s18 }
  0x39   : > { %1163 = dma.done.wait (%p1267_p8), %s181_s19, 1024  }
  0x3a   : > { %1165 = vsyncadd (%p1267_p8), %s181_s19, 4294966272  ;;  %vm219_vm0 = vcmask 130048   ;;  %v873_v0 = vld [vmem:[%s1463_s1 + $0x10] sm:$0xff]  ;;  %v874_v1 = vld [vmem:[%s1463_s1 + $0x18] sm:$0xff]  ;;  %s870_s29 = sshll.u32 %s1332_s11, 5  ;;  %vm753_vm1 = vcmask 261120  }
  0x3b   : > { %v871_v2 = vld [vmem:[%s1336_s21 + $0x10] sm:$0xff]  ;;  %v982_v3 = vpack.c.bf16 %v874_v1, %v873_v0  ;;  %v211_v5 = vld [vmem:[%s1463_s1] sm:$0xff]  ;;  %v212_v6 = vld [vmem:[%s1463_s1 + $0x8] sm:$0xff]  ;;  %s206_s30 = scalar_lea.vmem [#allocation5], %s870_s29  ;;  %s905_s5 = sshll.u32 %s1184_s15, 9 }
  0x3c   : > { %938 = vmatprep.mubr.msk.f32.mxu0 %vm219_vm0, %v871_v2  ;;  %v881_v4 = vld [vmem:[%s1336_s21 + $0x30] sm:$0xff]  ;;  %v986_v7 = vpack.c.bf16 %v212_v6, %v211_v5  ;;  %v872_v8 = vld [vmem:[%s1336_s21 + $0x18] sm:$0xff]  ;;  %v209_v10 = vld [vmem:[%s1336_s21] sm:$0xff]  ;;  %s774_s4 = sshll.u32 %s206_s30, 4  ;;  %s1411_s19 = scalar_lea.hbm %s1465_s3, %s905_s5  ;;  %s1405_s4 = int_to_ptr.vmem [resolvable:$true] %s774_s4 }
  0x3d   : > { %952 = vmatprep.mubr.msk.f32.mxu1 %vm219_vm0, %v881_v4  ;;  %983 = vmatprep.subr.bf16.mxu0 %v982_v3  ;;  %v882_v9 = vld [vmem:[%s1336_s21 + $0x38] sm:$0xff]  ;;  %v879_v11 = vld [vmem:[%s1336_s21 + $0x20] sm:$0xff]  ;;  %v210_v12 = vld [vmem:[%s1336_s21 + $0x8] sm:$0xff]  ;;  %s759_s15 = scalar_lea.sflag [#allocation4], %s1332_s11  ;;  %p1473_p9 = scmp.ne.s32.totalorder %s1469_s25, 0 }
  0x3e   : > { %991 = vmatprep.subr.bf16.mxu1 %v982_v3  ;;  %985 = vmatpush3.bf16.msra.mxu0 %v982_v3  ;;  %v880_v13 = vld [vmem:[%s1336_s21 + $0x28] sm:$0xff]  ;;  %v887_v14 = vld [vmem:[%s1464_s2 + $0x20] sm:$0xff]  ;;  %v889_v24 = vld [vmem:[%s1464_s2 + $0x30] sm:$0xff]  ;;  %s1110_s21 = scalar_lea.vmem %s1405_s4, 512  ;;  %s1197_s6 = smov [#allocation5]  }
  0x3f   : > { %993 = vmatpush3.bf16.msra.mxu1 %v982_v3  ;;  %987 = vmatprep.subr.bf16.mxu0 %v986_v7  ;;  %v382_v15 = vld [vmem:[%s1464_s2] sm:$0xff]  ;;  %v888_v22 = vld [vmem:[%s1464_s2 + $0x28] sm:$0xff]  ;;  %v384_v25 = vld [vmem:[%s1464_s2 + $0x10] sm:$0xff]  ;;  %p1111_p8 = scmp.ne.s32.totalorder %s1405_s4, %s1110_s21  ;;  %s1114_s8 = sshll.u32 %s1197_s6, 4  ;;  %s1115_s8 = int_to_ptr.vmem [resolvable:$false] %s1114_s8 }
  0x40   : > { %995 = vmatprep.subr.bf16.mxu1 %v986_v7  ;;  %v383_v23 = vld [vmem:[%s1464_s2 + $0x8] sm:$0xff]  ;;  %v890_v26 = vld [vmem:[%s1464_s2 + $0x38] sm:$0xff]  ;;  %s1116_s9 = scalar_lea.vmem %s1115_s8, 1024  ;;  %p1117_p6 = scmp.lt.s32.totalorder %s1405_s4, %s1115_s8 }
  0x41   : > { %939 = vmatmul.mubr.msk.f32.vlgmr.msra.gmra.mrb[0].mxu0 %vm219_vm0, %v872_v8  ;;  %v385_v27 = vld [vmem:[%s1464_s2 + $0x18] sm:$0xff]  ;;  %p1112_p11 = pnand %p1111_p8, %p1473_p9  ;;  %p1118_p13 = scmp.lt.s32.totalorder %s1116_s9, %s1110_s21 }
  0x42   : > { %953 = vmatmul.mubr.msk.f32.vlgmr.msra.gmra.mrb[0].mxu1 %vm219_vm0, %v882_v9  ;;  %989 = vmatpush3.bf16.msra.mxu0 %v986_v7 }
  0x43   : > { %997 = vmatpush3.bf16.msra.mxu1 %v986_v7  ;;  %945 = vmatprep.mubr.msk.f32.mxu0 %vm219_vm0, %v209_v10  ;;  %p1113_p0 = pneg %p1112_p11  ;;  %p1119_p2 = por %p1118_p13, %p1117_p6 }
  0x44   : > { %959 = vmatprep.mubr.msk.f32.mxu1 %vm219_vm0, %v879_v11 }
  0x45   : > { %p1120_p5 = pnand %p1119_p2, %p1113_p0 }
  0x49   : > { %946 = vmatmul.mubr.msk.f32.vlgmr.msra.gmra.mrb[0].mxu0 %vm219_vm0, %v210_v12 }
  0x4a   : > { %960 = vmatmul.mubr.msk.f32.vlgmr.msra.gmra.mrb[0].mxu1 %vm219_vm0, %v880_v13  ;;  %976 = vmatprep.mubr.msk.f32.mxu0 %vm219_vm0, %v382_v15 }
  0x4b   : > { %966 = vmatprep.mubr.msk.f32.mxu1 %vm219_vm0, %v887_v14 }
 0x11c   : > { %v947_v16 = vpop.f32.mrb[0].mxu0 }
 0x11d   : > { %v961_v17 = vpop.f32.mrb[0].mxu1  ;;  %v373_v18 = vpop.f32.mrb[1].mxu0 }
 0x11e   : > { %v545_v19 = vpop.f32.mrb[1].mxu1  ;;  %v1002_v20 = vpack.c.bf16 %v947_v16, %v373_v18 }
 0x11f   : > { %v998_v21 = vpack.c.bf16 %v961_v17, %v545_v19 }
 0x120   : > { %1003 = vmatprep.subr.bf16.mxu0 %v1002_v20 }
 0x121   : > { %999 = vmatprep.subr.bf16.mxu1 %v998_v21  ;;  %1005 = vmatpush3.bf16.msra.mxu0 %v1002_v20 }
 0x122   : > { %1001 = vmatpush3.bf16.msra.mxu1 %v998_v21 }
 0x124   : > { %977 = vmatmul.mubr.msk.f32.vlgmr.msra.gmra.mrb[2].mxu0 %vm219_vm0, %v383_v23 }
 0x125   : > { %967 = vmatmul.mubr.msk.f32.vlgmr.msra.gmra.mrb[2].mxu1 %vm219_vm0, %v888_v22  ;;  %979 = vmatprep.mubr.msk.f32.mxu0 %vm219_vm0, %v384_v25 }
 0x126   : > { %969 = vmatprep.mubr.msk.f32.mxu1 %vm219_vm0, %v889_v24 }
 0x128   : > { %980 = vmatmul.mubr.msk.f32.gmra.mrb[4].mxu0 %vm219_vm0, %v385_v27 }
 0x129   : > { %970 = vmatmul.mubr.msk.f32.gmra.mrb[4].mxu1 %vm219_vm0, %v890_v26 }
 0x1f7   : > { %v978_v29 = vpop.f32.mrb[2].mxu0 }
 0x1f8   : > { %v968_v28 = vpop.f32.mrb[2].mxu1  ;;  %v734_v32 = vpop.f32.mrb[3].mxu0 }
 0x1f9   : > { %v740_v30 = vadd.f32 %v978_v29, %v968_v28  ;;  %v637_v31 = vpop.f32.mrb[3].mxu1 }
 0x1fa   : > { %v735_v33 = vadd.f32 %v734_v32, %v637_v31 }
 0x1fb   : > { %755 = vst.msk [vmem:[%s206_s30 + $0x8] sm:$0xff] %vm753_vm1, %v740_v30  ;;  %v981_v35 = vpop.f32.mrb[4].mxu0 }
 0x1fc   : > { %754 = vst.msk [vmem:[%s206_s30] sm:$0xff] %vm753_vm1, %v735_v33  ;;  %v971_v34 = vpop.f32.mrb[4].mxu1  ;;  %v744_v38 = vpop.f32.mrb[5].mxu0 }
 0x1fd   : > { %v750_v36 = vadd.f32 %v981_v35, %v971_v34  ;;  %v647_v37 = vpop.f32.mrb[5].mxu1 }
 0x1fe   : > { %v745_v39 = vadd.f32 %v744_v38, %v647_v37 }
 0x1ff   : > { %757 = vst.msk [vmem:[%s206_s30 + $0x18] sm:$0xff] %vm753_vm1, %v750_v36 }
 0x200   : > { %756 = vst.msk [vmem:[%s206_s30 + $0x10] sm:$0xff] %vm753_vm1, %v745_v39 }
 0x201   : > { %1123 = shalt.err (!%p1120_p5)
}
 0x202   : > { %s1124_s10 = scalar_lea.hbm %s1411_s19, 512  ;;  %s1128_s23 = scalar_lea.hbm %s1465_s3, 1024 }
 0x203   : > { %p1125_p4 = scmp.ne.s32.totalorder %s1411_s19, %s1124_s10  ;;  %p1129_p12 = scmp.lt.u32.totalorder %s1411_s19, %s1465_s3 }
 0x204   : > { %p1130_p1 = scmp.lt.u32.totalorder %s1128_s23, %s1124_s10  ;;  %p1132_p8 = scmp.lt.u32.totalorder %s1124_s10, %s1411_s19 }
 0x205   : > { %p1126_p7 = pnand %p1125_p4, %p1473_p9 }
 0x206   : > { %p1131_p3 = por %p1130_p1, %p1129_p12 }
 0x207   : > { %p1127_p10 = pneg %p1126_p7 }
 0x208   : > { %p1133_p11 = por %p1132_p8, %p1131_p3 }
 0x20a   : > { %p1134_p0 = pnand %p1133_p11, %p1127_p10 }
 0x20c   : > { %1137 = shalt.err (!%p1134_p0)
}
 0x20d   : > { %s1198_s30 = smov 128   ;;  %s1199_s5 = smov 8  }
 0x20e   : > { %1016 = dma.vmem_to_hbm [thread:$0]  (%p1473_p9), %s1405_s4, 512, %s1411_s19, %s759_s15, %s1198_s30, %s1198_s30, %s1199_s5  }
 0x20f PF: > { %s789_s7 = sand.u32 1, %s1172_s12   ;;  %p1474_p6 = scmp.ne.s32.totalorder %s1470_s27, 0 }
 0x210   : > { %p1475_p13 = scmp.ge.s32.totalorder %s1192_s17, 2  ;;  %s790_s18 = scalar_lea.sflag [#allocation4], %s789_s7 }
 0x212   : > { %p1023_p2 = pnand %p1475_p13, %p1474_p6 }
 0x214   : > { %1167 = dma.done.wait (!%p1023_p2), %s790_s18, 512  }
 0x215   : > { %1169 = vsyncadd (!%p1023_p2), %s790_s18, 4294966784  ;;  %s19_s17 = sadd.s32 1, %s1192_s17   ;;  %s1476_s12 = smov %s1176_s13 }
 0x216   : > { %p16_p5 = scmp.ge.s32.totalorder %s19_s17, 4   ;;  %s1477_s13 = smov %s1180_s14 }
 0x217   : > { %s1478_s14 = smov %s1276_s26  ;;  %s1479_s15 = smov %s1188_s16 }
 0x218   : > { %s1480_s16 = smov %s1482_s20  ;;  %18 = sbr.rel (!%p16_p5) target bundleno = 6 (0x6), region = 82 }
 0x21f   :  { %795 = vsyncpa [#allocation3], 1 }
 0x220   :  { %797 = vsyncpa [#allocation3 + $0x1], 1 }
 0x221   :  { %798 = vsyncpa [#allocation4], 1 }
 0x222   :  { %800 = vsyncpa [#allocation4 + $0x1], 1 }

</bundles_post_ra>
